<compile_context>
chip_gen: v7x
topology: tpu7x:2x2x1
jax: 0.10.0
libtpu: 0.0.40
codegen_flags: <defaults>
</compile_context>

<pallas_src>
import functools

import jax
import jax.numpy as jnp
from jax.experimental import pallas as pl
from jax.experimental.pallas import tpu as pltpu


def _round_up(x: int, m: int) -> int:
    return ((x + m - 1) // m) * m


def decoder_kernel(z_ref, w1_ref, b1_ref, wh_ref, bh_ref, out_ref, *, num_dim: int):
    # z_ref: [TB, z_dim] bf16        w1_ref: [z_dim, H] bf16   b1_ref: [1, H] f32
    # wh_ref: [H, out_pad] bf16      bh_ref: [1, out_pad] f32
    # out_ref: [TB, out_pad] f32

    # fc1 + ReLU (bf16 operands, f32 accumulate / epilogue)
    h = jnp.dot(z_ref[...], w1_ref[...], preferred_element_type=jnp.float32)
    h = jnp.maximum(h + b1_ref[...], 0.0)

    # Fused heads: one wide matmul for [num | cat] columns.
    y = jnp.dot(h.astype(jnp.bfloat16), wh_ref[...],
                preferred_element_type=jnp.float32)
    y = y + bh_ref[...]

    # Sigmoid only on columns >= num_dim (categorical head + padding; the
    # padded columns are sliced off in the wrapper, so sigmoid(0)=0.5 there
    # never leaks into the result).
    col = jax.lax.broadcasted_iota(jnp.int32, y.shape, 1)
    y = jnp.where(col >= num_dim, jax.nn.sigmoid(y), y)

    out_ref[...] = y.astype(out_ref.dtype)


def decoder_forward(z, params, *, tb: int = 512):
    """z: [B, z_dim] float32. params: transposed weights / 2-D biases (f32)."""
    B, z_dim = z.shape
    hidden_dim = params["w1"].shape[1]
    num_dim = params["w_num"].shape[1]
    cat_dim = params["w_cat"].shape[1]
    out_dim = num_dim + cat_dim
    out_pad = _round_up(out_dim, 128)          # lane-dense output slab

    # Batch tile: multiple of 8 sublanes, at most `tb`, covers small batches.
    TB = min(tb, _round_up(B, 8))
    B_pad = _round_up(B, TB)
    grid = (B_pad // TB,)

    # --- wrapper-side fusion / padding / dtype prep ---------------------
    w_heads = jnp.zeros((hidden_dim, out_pad), jnp.float32)
    w_heads = w_heads.at[:, :num_dim].set(params["w_num"])
    w_heads = w_heads.at[:, num_dim:out_dim].set(params["w_cat"])
    b_heads = jnp.zeros((1, out_pad), jnp.float32)
    b_heads = b_heads.at[:, :num_dim].set(params["b_num"])
    b_heads = b_heads.at[:, num_dim:out_dim].set(params["b_cat"])

    z_in = jnp.pad(z, ((0, B_pad - B), (0, 0))).astype(jnp.bfloat16)
    w1_bf = params["w1"].astype(jnp.bfloat16)
    wh_bf = w_heads.astype(jnp.bfloat16)
    b1 = params["b1"].astype(jnp.float32)

    flops = 2 * B_pad * (z_dim * hidden_dim + hidden_dim * out_pad)
    bytes_accessed = (z_in.size * 2 + w1_bf.size * 2 + wh_bf.size * 2
                      + b1.size * 4 + b_heads.size * 4 + B_pad * out_pad * 4)
    transcendentals = B_pad * (out_pad - num_dim)

    kernel = functools.partial(decoder_kernel, num_dim=num_dim)

    out_padded = pl.pallas_call(
        kernel,
        out_shape=jax.ShapeDtypeStruct((B_pad, out_pad), jnp.float32),
        grid=grid,
        in_specs=[
            pl.BlockSpec((TB, z_dim), lambda i: (i, 0)),            # z tile
            pl.BlockSpec((z_dim, hidden_dim), lambda i: (0, 0)),    # W1 (resident)
            pl.BlockSpec((1, hidden_dim), lambda i: (0, 0)),        # b1
            pl.BlockSpec((hidden_dim, out_pad), lambda i: (0, 0)),  # W_heads
            pl.BlockSpec((1, out_pad), lambda i: (0, 0)),           # b_heads
        ],
        out_specs=pl.BlockSpec((TB, out_pad), lambda i: (i, 0)),
        compiler_params=pltpu.CompilerParams(
            dimension_semantics=("parallel",),
        ),
        cost_estimate=pl.CostEstimate(
            flops=flops,
            bytes_accessed=bytes_accessed,
            transcendentals=transcendentals,
        ),
    )(z_in, w1_bf, b1, wh_bf, b_heads)

    return out_padded[:B, :out_dim]


def init_params(key, z_dim, hidden_dim, num_dim, cat_dim):
    """Deterministic synthetic parameters (PyTorch-style fan-in uniform init)."""
    ks = jax.random.split(key, 6)

    def linear(kw, kb, fan_in, fan_out):
        bound = 1.0 / jnp.sqrt(fan_in)
        # stored as [in, out]  (transpose of PyTorch's [out, in])
        w = jax.random.uniform(kw, (fan_in, fan_out), jnp.float32, -bound, bound)
        b = jax.random.uniform(kb, (1, fan_out), jnp.float32, -bound, bound)
        return w, b

    w1, b1 = linear(ks[0], ks[1], z_dim, hidden_dim)
    w_num, b_num = linear(ks[2], ks[3], hidden_dim, num_dim)
    w_cat, b_cat = linear(ks[4], ks[5], hidden_dim, cat_dim)
    return {"w1": w1, "b1": b1,
            "w_num": w_num, "b_num": b_num,
            "w_cat": w_cat, "b_cat": b_cat}


def reference_forward_bf16(z, params):
    """Pure-JAX reference using the same bf16 MXU-operand casts as the kernel."""
    z_bf = z.astype(jnp.bfloat16)
    w1_bf = params["w1"].astype(jnp.bfloat16)
    h = jnp.dot(z_bf, w1_bf, preferred_element_type=jnp.float32) + params["b1"]
    h = jnp.maximum(h, 0.0)
    h_bf = h.astype(jnp.bfloat16)
    num = jnp.dot(h_bf, params["w_num"].astype(jnp.bfloat16),
                  preferred_element_type=jnp.float32) + params["b_num"]
    cat = jax.nn.sigmoid(
        jnp.dot(h_bf, params["w_cat"].astype(jnp.bfloat16),
                preferred_element_type=jnp.float32) + params["b_cat"])
    return jnp.concatenate([num, cat], axis=1)


def reference_forward_f32(z, params):
    """Full-precision reference of the PyTorch forward."""
    h = jax.nn.relu(z @ params["w1"] + params["b1"])
    num_out = h @ params["w_num"] + params["b_num"]
    cat_out = jax.nn.sigmoid(h @ params["w_cat"] + params["b_cat"])
    return jnp.concatenate([num_out, cat_out], axis=1)


if __name__ == "__main__":
    # Small shapes consistent with the module's forward.
    B, z_dim, hidden_dim, num_dim, cat_dim = 8, 16, 32, 8, 8

    key = jax.random.PRNGKey(0)
    k_z, k_p = jax.random.split(key)

    z = jax.random.normal(k_z, (B, z_dim), dtype=jnp.float32)
    params = init_params(k_p, z_dim, hidden_dim, num_dim, cat_dim)

    out = decoder_forward(z, params)
    out = jax.block_until_ready(out)

    assert out.shape == (B, num_dim + cat_dim)

    # Tight check vs a bf16-consistent reference (verifies fusion/mask/padding).
    ref_bf16 = reference_forward_bf16(z, params)
    assert jnp.allclose(out, ref_bf16, atol=1e-3, rtol=1e-3), "mismatch vs bf16 ref"

    # Loose check vs the full-f32 PyTorch-equivalent reference.
    ref_f32 = reference_forward_f32(z, params)
    assert jnp.allclose(out, ref_f32, atol=3e-2, rtol=3e-2), "mismatch vs f32 ref"

    print("KERNEL_OK")
</pallas_src>

<mosaic_0001>
module attributes {stable_mosaic.version = 11 : i64} {
  func.func @decoder_kernel(%arg0: i32, %arg1: memref<8x16xbf16, #tpu.memory_space<vmem>>, %arg2: memref<16x32xbf16, #tpu.memory_space<vmem>>, %arg3: memref<1x32xf32, #tpu.memory_space<vmem>>, %arg4: memref<32x128xbf16, #tpu.memory_space<vmem>>, %arg5: memref<1x128xf32, #tpu.memory_space<vmem>>, %arg6: memref<8x128xf32, #tpu.memory_space<vmem>>) attributes {dimension_semantics = [#tpu.dimension_semantics<parallel>], iteration_bounds = array<i64: 1>, scalar_prefetch = 0 : i64, scratch_operands = 0 : i64, tpu.core_type = #tpu.core_type<tc>, window_params = [{transform_indices = @transform_0, window_bounds = array<i64: 8, 16>}, {pipeline_mode = #tpu.pipeline_mode<synchronous>, transform_indices = @transform_1, window_bounds = array<i64: 16, 32>}, {pipeline_mode = #tpu.pipeline_mode<synchronous>, transform_indices = @transform_2, window_bounds = array<i64: 1, 32>}, {pipeline_mode = #tpu.pipeline_mode<synchronous>, transform_indices = @transform_3, window_bounds = array<i64: 32, 128>}, {pipeline_mode = #tpu.pipeline_mode<synchronous>, transform_indices = @transform_4, window_bounds = array<i64: 1, 128>}, {transform_indices = @transform_5, window_bounds = array<i64: 8, 128>}]} {
    %c0 = arith.constant 0 : index
    %c0_0 = arith.constant 0 : index
    %0 = vector.load %arg1[%c0, %c0_0] : memref<8x16xbf16, #tpu.memory_space<vmem>>, vector<8x16xbf16>
    %c0_1 = arith.constant 0 : index
    %c0_2 = arith.constant 0 : index
    %1 = vector.load %arg2[%c0_1, %c0_2] : memref<16x32xbf16, #tpu.memory_space<vmem>>, vector<16x32xbf16>
    %cst = arith.constant dense<0.000000e+00> : vector<8x32xf32>
    %2 = tpu.matmul %0, %1, %cst {dimension_numbers = #tpu.dot_dimension_numbers<[1], [0], [0], [1], [0, 0, 1, 1], [], []>} : vector<8x16xbf16>, vector<16x32xbf16>, vector<8x32xf32> -> vector<8x32xf32>
    %c0_3 = arith.constant 0 : index
    %c0_4 = arith.constant 0 : index
    %3 = vector.load %arg3[%c0_3, %c0_4] : memref<1x32xf32, #tpu.memory_space<vmem>>, vector<1x32xf32>
    %4 = vector.broadcast %3 : vector<1x32xf32> to vector<8x32xf32>
    %5 = arith.addf %2, %4 : vector<8x32xf32>
    %cst_5 = arith.constant 0.000000e+00 : f32
    %6 = vector.broadcast %cst_5 : f32 to vector<8x32xf32>
    %7 = arith.maximumf %5, %6 : vector<8x32xf32>
    %8 = arith.truncf %7 : vector<8x32xf32> to vector<8x32xbf16>
    %c0_6 = arith.constant 0 : index
    %c0_7 = arith.constant 0 : index
    %9 = vector.load %arg4[%c0_6, %c0_7] : memref<32x128xbf16, #tpu.memory_space<vmem>>, vector<32x128xbf16>
    %cst_8 = arith.constant dense<0.000000e+00> : vector<8x128xf32>
    %10 = tpu.matmul %8, %9, %cst_8 {dimension_numbers = #tpu.dot_dimension_numbers<[1], [0], [0], [1], [0, 0, 1, 1], [], []>} : vector<8x32xbf16>, vector<32x128xbf16>, vector<8x128xf32> -> vector<8x128xf32>
    %c0_9 = arith.constant 0 : index
    %c0_10 = arith.constant 0 : index
    %11 = vector.load %arg5[%c0_9, %c0_10] : memref<1x128xf32, #tpu.memory_space<vmem>>, vector<1x128xf32>
    %12 = vector.broadcast %11 : vector<1x128xf32> to vector<8x128xf32>
    %13 = arith.addf %10, %12 : vector<8x128xf32>
    %14 = tpu.iota {dimensions = array<i32: 1>} : vector<8x128xi32>
    %c8_i32 = arith.constant 8 : i32
    %15 = vector.broadcast %c8_i32 : i32 to vector<8x128xi32>
    %16 = arith.cmpi sge, %14, %15 : vector<8x128xi32>
    %17 = arith.negf %13 : vector<8x128xf32>
    %18 = math.exp %17 : vector<8x128xf32>
    %cst_11 = arith.constant 1.000000e+00 : f32
    %19 = vector.broadcast %cst_11 : f32 to vector<8x128xf32>
    %20 = arith.addf %19, %18 : vector<8x128xf32>
    %21 = arith.divf %19, %20 : vector<8x128xf32>
    %22 = arith.select %16, %21, %13 : vector<8x128xi1>, vector<8x128xf32>
    %c0_12 = arith.constant 0 : index
    %c0_13 = arith.constant 0 : index
    %23 = vector.load %arg6[%c0_12, %c0_13] : memref<8x128xf32, #tpu.memory_space<vmem>>, vector<8x128xf32>
    tpu.vector_store %arg6[%c0_12, %c0_13], %22 {strides = array<i32>} : memref<8x128xf32, #tpu.memory_space<vmem>>, vector<8x128xf32>,
    return
  }
  func.func @transform_0(%arg0: i32) -> (i32, i32) {
    %c0_i32 = arith.constant 0 : i32
    %c0_i32_0 = arith.constant 0 : i32
    return %arg0, %c0_i32 : i32, i32
  }
  func.func @transform_1(%arg0: i32) -> (i32, i32) {
    %c0_i32 = arith.constant 0 : i32
    %c0_i32_0 = arith.constant 0 : i32
    %c0_i32_1 = arith.constant 0 : i32
    return %c0_i32, %c0_i32_0 : i32, i32
  }
  func.func @transform_2(%arg0: i32) -> (i32, i32) {
    %c0_i32 = arith.constant 0 : i32
    %c0_i32_0 = arith.constant 0 : i32
    %c0_i32_1 = arith.constant 0 : i32
    return %c0_i32, %c0_i32_0 : i32, i32
  }
  func.func @transform_3(%arg0: i32) -> (i32, i32) {
    %c0_i32 = arith.constant 0 : i32
    %c0_i32_0 = arith.constant 0 : i32
    %c0_i32_1 = arith.constant 0 : i32
    return %c0_i32, %c0_i32_0 : i32, i32
  }
  func.func @transform_4(%arg0: i32) -> (i32, i32) {
    %c0_i32 = arith.constant 0 : i32
    %c0_i32_0 = arith.constant 0 : i32
    %c0_i32_1 = arith.constant 0 : i32
    return %c0_i32, %c0_i32_0 : i32, i32
  }
  func.func @transform_5(%arg0: i32) -> (i32, i32) {
    %c0_i32 = arith.constant 0 : i32
    %c0_i32_0 = arith.constant 0 : i32
    return %arg0, %c0_i32 : i32, i32
  }
}

</mosaic_0001>

<bundles_post_ra>
// kernel: tpu_custom_call.1
= control target key start
LH: loop header
LB: loop body
LE: loop exit
PB: predicated region body
PF: predicated region fallthrough
CT: control target
= control target key end

     0   :  { %10 = vsyncpa [#allocation3], 0  ;;  %s451_s0 = inlined_call_operand.hbm [shape: bf16[8,16], index: 0, kind: input, shape index: {}]   ;;  %s452_s1 = inlined_call_operand.hbm [shape: bf16[16,32], index: 1, kind: input, shape index: {}]   ;;  %s453_s2 = inlined_call_operand.vmem [shape: f32[1,32], index: 2, kind: input, shape index: {}]   ;;  %s454_s3 = inlined_call_operand.hbm [shape: bf16[32,128], index: 3, kind: input, shape index: {}]   ;;  %s455_s4 = inlined_call_operand.vmem [shape: f32[1,128], index: 4, kind: input, shape index: {}]   ;;  %s456_s5 = inlined_call_operand.hbm [shape: f32[8,128], index: 5, kind: output, shape index: {}]  }
   0x1   :  { %11 = vsyncpa [#allocation6], 0 }
   0x2   :  { %12 = vsyncpa [#allocation4], 0  ;;  %s353_s18 = smov [#allocation5]   ;;  %s259_s22 = scalar_lea.hbm %s452_s1, 128 }
   0x3   :  { %s28_s19 = sshll.u32 %s353_s18, 4  ;;  %p260_p0 = scmp.ne.s32.totalorder %s452_s1, %s259_s22  ;;  %s29_s19 = int_to_ptr.vmem [resolvable:$true] %s28_s19 }
   0x4   :  { %p263_p1 = scmp.lt.u32.totalorder %s259_s22, %s452_s1 }
   0x6   :  { %p265_p2 = pnand %p263_p1, %p260_p0 }
   0x8   :  { %268 = shalt.err (!%p265_p2)
}
   0x9   :  { %s269_s27 = scalar_lea.vmem %s29_s19, 128  ;;  %p274_p4 = scmp.lt.s32.totalorder %s29_s19, %s29_s19 }
   0xa   :  { %p270_p3 = scmp.ne.s32.totalorder %s29_s19, %s269_s27  ;;  %p275_p5 = scmp.lt.s32.totalorder %s269_s27, %s269_s27 }
   0xc   :  { %p276_p6 = por %p275_p5, %p274_p4 }
   0xe   :  { %p277_p7 = pnand %p276_p6, %p270_p3 }
  0x10   :  { %280 = shalt.err (!%p277_p7)
}
  0x11   :  { %s354_s28 = smov 64   ;;  %s355_s29 = smov 4  }
  0x12   :  { %34 = dma.hbm_to_vmem [thread:$0]  %s452_s1, 128, %s29_s19, [#allocation6], %s354_s28, %s354_s28, %s355_s29  }
  0x13   :  { %s356_s7 = smov [#allocation2]   ;;  %s357_s9 = smov [#allocation7]  }
  0x14   :  { %s19_s8 = sshll.u32 %s356_s7, 4  ;;  %s42_s10 = sshll.u32 %s357_s9, 4  ;;  %s20_s8 = int_to_ptr.vmem [resolvable:$true] %s19_s8  ;;  %s43_s10 = int_to_ptr.vmem [resolvable:$true] %s42_s10 }
  0x15   :  { %s281_s13 = scalar_lea.hbm %s451_s0, 64 }
  0x16   :  { %p282_p8 = scmp.ne.s32.totalorder %s451_s0, %s281_s13  ;;  %p285_p9 = scmp.lt.u32.totalorder %s281_s13, %s451_s0 }
  0x18   :  { %p287_p10 = pnand %p285_p9, %p282_p8 }
  0x1a   :  { %290 = shalt.err (!%p287_p10)
}
  0x1b   :  { %s291_s1 = scalar_lea.vmem %s20_s8, 64  ;;  %p296_p12 = scmp.lt.s32.totalorder %s20_s8, %s20_s8 }
  0x1c   :  { %p292_p11 = scmp.ne.s32.totalorder %s20_s8, %s291_s1  ;;  %p297_p13 = scmp.lt.s32.totalorder %s291_s1, %s291_s1 }
  0x1e   :  { %p298_p0 = por %p297_p13, %p296_p12 }
  0x20   :  { %p299_p1 = pnand %p298_p0, %p292_p11 }
  0x22   :  { %302 = shalt.err (!%p299_p1)
}
  0x23   :  { %22 = dma.hbm_to_vmem [thread:$0]  %s451_s0, 64, %s20_s8, [#allocation3]  }
  0x24   :  { %s303_s22 = scalar_lea.hbm %s454_s3, 256 }
  0x25   :  { %p304_p2 = scmp.ne.s32.totalorder %s454_s3, %s303_s22  ;;  %p307_p3 = scmp.lt.u32.totalorder %s303_s22, %s454_s3 }
  0x27   :  { %p309_p4 = pnand %p307_p3, %p304_p2 }
  0x29   :  { %312 = shalt.err (!%p309_p4)
}
  0x2a   :  { %s313_s27 = scalar_lea.vmem %s43_s10, 256  ;;  %p318_p6 = scmp.lt.s32.totalorder %s43_s10, %s43_s10 }
  0x2b   :  { %p314_p5 = scmp.ne.s32.totalorder %s43_s10, %s313_s27  ;;  %p319_p7 = scmp.lt.s32.totalorder %s313_s27, %s313_s27 }
  0x2d   :  { %p320_p8 = por %p319_p7, %p318_p6 }
  0x2f   :  { %p321_p9 = pnand %p320_p8, %p314_p5 }
  0x31   :  { %324 = shalt.err (!%p321_p9)
}
  0x32   :  { %48 = dma.hbm_to_vmem [thread:$0]  %s454_s3, 256, %s43_s10, [#allocation6], %s354_s28, %s354_s28, %s355_s29  }
  0x33   :  { %347 = dma.done.wait [#allocation3], 64  }
  0x34   :  { %348 = vsyncadd [#allocation3], 4294967232 }
  0x35   :  { %349 = dma.done.wait [#allocation6], 384  }
  0x36   :  { %350 = vsyncadd [#allocation6], 4294966912  ;;  %v358_v0 = vmov 0.0   ;;  %vm359_vm0 = vmmov 0   ;;  %v252_v1 = vld [vmem:[#allocation5] sm:$0xff]   ;;  %vm77_vm1 = vcmask 130048   ;;  %v190_v22 = vlaneseq }
  0x37   :  { %230 = vmatprep.subr.bf16.mxu0 %v358_v0  ;;  %232 = vmatprep.mubr.msk.bf16.mxu0 %vm359_vm0, %v358_v0  ;;  %v61_v2 = vld [vmem:[#allocation2] sm:$0xf]  ;;  %v253_v3 = vld [vmem:[#allocation7] sm:$0xff]   ;;  %v254_v4 = vld [vmem:[#allocation7 + $0x8] sm:$0xff]   ;;  %vm146_vm2 = vcmask 261120  }
  0x38   :  { %236 = vmatprep.subr.bf16.mxu1 %v358_v0  ;;  %240 = vmatprep.mubr.msk.bf16.mxu1 %vm359_vm0, %v358_v0  ;;  %v217_v5 = vld [vmem:[%s453_s2] ss:$0 sm:$0xff]  ;;  %v191_v23 = vand.u32 127, %v190_v22  ;;  %s360_s2 = smov [#allocation8]  }
  0x39   :  { %231 = vmatpush3.bf16.msra.mxu0 %v252_v1  ;;  %237 = vmatpush3.bf16.msra.mxu1 %v253_v3  ;;  %v220_v13 = vld [vmem:[%s455_s4] ss:$0 sm:$0xff]  ;;  %s207_s7 = sshll.u32 %s360_s2, 4  ;;  %s208_s7 = int_to_ptr.vmem [resolvable:$true] %s207_s7 }
  0x3a   :  { %238 = vmatprep.subr.bf16.mxu1 %v358_v0  ;;  %vm192_vm3 = vcmp.ge.s32.totalorder %v191_v23, 8  ;;  %s325_s4 = scalar_lea.vmem %s208_s7, 128  ;;  %p330_p11 = scmp.lt.s32.totalorder %s208_s7, %s208_s7 }
  0x3b   :  { %p326_p10 = scmp.ne.s32.totalorder %s208_s7, %s325_s4  ;;  %p331_p12 = scmp.lt.s32.totalorder %s325_s4, %s325_s4 }
  0x3c   :  { %233 = vmatmul.mubr.msk.bf16.vlgmr.msra.gmra.mrb[0].mxu0 %vm77_vm1, %v61_v2 }
  0x3d   :  { %239 = vmatpush3.bf16.msra.mxu1 %v254_v4  ;;  %p332_p13 = por %p331_p12, %p330_p11 }
  0x3f   :  { %p333_p0 = pnand %p332_p13, %p326_p10 }
 0x10f   :  { %v115_v6 = vpop.f32.mrb[0].mxu0 }
 0x110   :  { %v116_v7 = vadd.f32 %v217_v5, %v115_v6  ;;  %v234_v8 = vpop.f32.mrb[1].mxu0 }
 0x111   :  { %v118_v9 = vpop.f32.mrb[2].mxu0 }
 0x112   :  { %v121_v10 = vmax.f32 %v116_v7, 0.0  ;;  %v235_v11 = vpop.f32.mrb[3].mxu0 }
 0x114   :  { %v122_v12 = vpack.c.bf16 %v121_v10, %v121_v10 }
 0x116   :  { %241 = vmatmul.mubr.msk.bf16.vlgmr.msra.gmra.mrb[0].mxu1 %vm146_vm2, %v122_v12 }
 0x1e9   :  { %v184_v14 = vpop.f32.mrb[0].mxu1 }
 0x1ea   :  { %v185_v15 = vadd.f32 %v220_v13, %v184_v14  ;;  %v242_v16 = vpop.f32.mrb[1].mxu1 }
 0x1eb   :  { %v187_v17 = vpop.f32.mrb[2].mxu1 }
 0x1ec   :  { %v224_v18 = vmul.f32 -1.442695, %v185_v15  ;;  %v243_v19 = vpop.f32.mrb[3].mxu1 }
 0x1ee   :  { %255 = vpow2.f32 %v224_v18 }
 0x1f8   :  { %v256_v20 = vpop.eup %255 }
 0x1f9   :  { %v196_v21 = vadd.f32 1.0, %v256_v20 }
 0x1fb   :  { %257 = vrcp.f32 %v196_v21 }
 0x205   :  { %v258_v24 = vpop.eup %257 }
 0x206   :  { %v199_v25 = vsel %vm192_vm3, %v258_v24, %v185_v15 }
 0x207   :  { %200 = vst [vmem:[#allocation8] sm:$0xff] %v199_v25 }
 0x208   :  { %336 = shalt.err (!%p333_p0)
}
 0x209   :  { %s337_s10 = scalar_lea.hbm %s456_s5, 128 }
 0x20a   :  { %p338_p1 = scmp.ne.s32.totalorder %s456_s5, %s337_s10  ;;  %p341_p2 = scmp.lt.u32.totalorder %s337_s10, %s456_s5 }
 0x20c   :  { %p343_p3 = pnand %p341_p2, %p338_p1 }
 0x20e   :  { %346 = shalt.err (!%p343_p3)
}
 0x20f   :  { %210 = dma.vmem_to_hbm [thread:$0]  %s208_s7, 128, %s456_s5, [#allocation4]  }
 0x210   :  { %351 = dma.done.wait [#allocation4], 128  }
 0x211   :  { %352 = vsyncadd [#allocation4], 4294967168 }
 0x212   :  { %214 = vsyncpa [#allocation3], 1 }
 0x213   :  { %215 = vsyncpa [#allocation6], 1 }
 0x214   :  { %216 = vsyncpa [#allocation4], 1 }

</bundles_post_ra>
